<compile_context>
chip_gen: v7x
topology: tpu7x:2x2x1
jax: 0.10.0
libtpu: 0.0.40
codegen_flags: <defaults>
</compile_context>

<pallas_src>
import functools

import jax
import jax.numpy as jnp
from jax.experimental import pallas as pl
from jax.experimental.pallas import tpu as pltpu


def _residual_block_kernel(x_ref, m_ref, w1_ref, g1_ref, b1_ref,
                           w2_ref, g2_ref, b2_ref, o_ref,
                           *, HW, eps, BT, taps):
    # Refs (per grid step):
    #   x_ref  : (BT, C, HW)      input block (also the residual branch)
    #   m_ref  : (9, 1, HW)       per-tap zero-padding validity masks (f32 0/1)
    #   w1_ref : (3, 3, Cout, Cin)  conv1 weight, tap-major
    #   g1/b1  : (Cout, 1)        instance-norm-1 affine params
    #   w2_ref : (3, 3, Cout, Cout) conv2 weight
    #   g2/b2  : (Cout, 1)        instance-norm-2 affine params
    #   o_ref  : (BT, C, HW)      output block
    inv_hw = 1.0 / float(HW)
    n_taps = len(taps)

    # Hoist invariant loads once; reused for both convs and every batch element.
    masks = [m_ref[t] for t in range(n_taps)]                   # each (1, HW)
    w1_taps = [w1_ref[t // 3, t % 3] for t in range(n_taps)]    # each (Cout, Cin)
    w2_taps = [w2_ref[t // 3, t % 3] for t in range(n_taps)]
    g1, b1 = g1_ref[...], b1_ref[...]                           # (Cout, 1)
    g2, b2 = g2_ref[...], b2_ref[...]

    def conv3x3(xin, w_taps):
        # xin: (Cin, HW). 9 MXU matmuls accumulated in f32.
        acc = None
        for t, off in enumerate(taps):
            if off == 0:
                shifted = xin                       # center tap: no shift, mask all-ones
            else:
                shifted = pltpu.roll(xin, shift=(-off) % HW, axis=1)  # XLU rotate
                shifted = shifted * masks[t]        # zero out wrapped / out-of-image taps
            part = jnp.dot(w_taps[t], shifted, preferred_element_type=jnp.float32)
            acc = part if acc is None else acc + part
        return acc                                  # (Cout, HW) f32

    def inorm(a, g, b):
        # Per-channel stats over the flattened spatial axis; one-pass biased variance.
        mean = jnp.sum(a, axis=1, keepdims=True) * inv_hw
        mean_sq = jnp.sum(a * a, axis=1, keepdims=True) * inv_hw
        var = mean_sq - mean * mean
        return (a - mean) * jax.lax.rsqrt(var + eps) * g + b

    for bt in range(BT):
        x = x_ref[bt]                                            # (C, HW)
        h = jnp.maximum(inorm(conv3x3(x, w1_taps), g1, b1), 0.0)  # conv1 + IN1 + ReLU
        h2 = inorm(conv3x3(h, w2_taps), g2, b2)                   # conv2 + IN2
        o_ref[bt] = x + h2                                        # residual add


def residual_block(x_nchw, w1_oihw, g1, b1, w2_oihw, g2, b2, eps=1e-5):
    """ResidualBlock forward. x_nchw: (B, C, H, W); conv weights in OIHW."""
    x = x_nchw.astype(jnp.float32)
    B, Cin, H, W = x.shape
    Cout = int(w1_oihw.shape[0])
    assert Cin == Cout, "residual add requires dim_in == dim_out"
    HW = H * W

    # Batch tile: >1 element per grid step amortizes the ~0.35us per-step
    # overhead; keep >=2 grid steps when possible so the 'parallel' grid axis
    # can shard across v7x's two TensorCores.
    if B <= 2:
        BT = 1
    else:
        BT = next((d for d in (4, 3, 2) if B % d == 0), 1)

    # Free reshapes / small transposes (glue, no spatial transpose of activations).
    x_flat = x.reshape(B, Cin, HW)
    w1 = jnp.transpose(w1_oihw.astype(jnp.float32), (2, 3, 0, 1))   # (3,3,Cout,Cin)
    w2 = jnp.transpose(w2_oihw.astype(jnp.float32), (2, 3, 0, 1))   # (3,3,Cout,Cout)
    g1c = g1.astype(jnp.float32).reshape(Cout, 1)
    b1c = b1.astype(jnp.float32).reshape(Cout, 1)
    g2c = g2.astype(jnp.float32).reshape(Cout, 1)
    b2c = b2.astype(jnp.float32).reshape(Cout, 1)

    # 3x3 tap offsets (row-major over kh, kw) in the flattened spatial index,
    # and their zero-padding validity masks at every output position.
    pos = jnp.arange(HW, dtype=jnp.int32)
    row, col = pos // W, pos % W
    taps, masks = [], []
    for ddh in (-1, 0, 1):
        for ddw in (-1, 0, 1):
            taps.append(ddh * W + ddw)
            masks.append((row + ddh >= 0) & (row + ddh < H) &
                         (col + ddw >= 0) & (col + ddw < W))
    tap_masks = jnp.stack(masks).astype(jnp.float32).reshape(9, 1, HW)

    kernel = functools.partial(_residual_block_kernel,
                               HW=HW, eps=float(eps), BT=BT, taps=tuple(taps))

    out_flat = pl.pallas_call(
        kernel,
        out_shape=jax.ShapeDtypeStruct((B, Cout, HW), jnp.float32),
        grid_spec=pltpu.PrefetchScalarGridSpec(
            num_scalar_prefetch=0,
            grid=(B // BT,),
            in_specs=[
                pl.BlockSpec((BT, Cin, HW), lambda i: (i, 0, 0)),
                pl.BlockSpec((9, 1, HW), lambda i: (0, 0, 0)),
                pl.BlockSpec((3, 3, Cout, Cin), lambda i: (0, 0, 0, 0)),
                pl.BlockSpec((Cout, 1), lambda i: (0, 0)),
                pl.BlockSpec((Cout, 1), lambda i: (0, 0)),
                pl.BlockSpec((3, 3, Cout, Cout), lambda i: (0, 0, 0, 0)),
                pl.BlockSpec((Cout, 1), lambda i: (0, 0)),
                pl.BlockSpec((Cout, 1), lambda i: (0, 0)),
            ],
            out_specs=pl.BlockSpec((BT, Cout, HW), lambda i: (i, 0, 0)),
        ),
        compiler_params=pltpu.CompilerParams(
            dimension_semantics=("parallel",)),
    )(x_flat, tap_masks, w1, g1c, b1c, w2, g2c, b2c)

    return out_flat.reshape(B, Cout, H, W)


def _reference(x, w1, g1, b1, w2, g2, b2, eps=1e-5):
    """Pure-JAX reference (NCHW, matches PyTorch training-mode forward)."""
    def conv(x, w):
        return jax.lax.conv_general_dilated(
            x, w, window_strides=(1, 1), padding=((1, 1), (1, 1)),
            dimension_numbers=("NCHW", "OIHW", "NCHW"),
            precision=jax.lax.Precision.HIGHEST)

    def inorm(x, g, b):
        mean = jnp.mean(x, axis=(2, 3), keepdims=True)
        var = jnp.mean((x - mean) ** 2, axis=(2, 3), keepdims=True)
        xn = (x - mean) * jax.lax.rsqrt(var + eps)
        return xn * g.reshape(1, -1, 1, 1) + b.reshape(1, -1, 1, 1)

    h = jnp.maximum(inorm(conv(x, w1), g1, b1), 0.0)
    h = inorm(conv(h, w2), g2, b2)
    return x + h


if __name__ == "__main__":
    B, C, H, W = 2, 4, 16, 16       # dim_in == dim_out == 4
    key = jax.random.PRNGKey(0)
    kx, kw1, kw2, kg1, kb1, kg2, kb2 = jax.random.split(key, 7)

    x = jax.random.normal(kx, (B, C, H, W), jnp.float32)
    w1 = 0.1 * jax.random.normal(kw1, (C, C, 3, 3), jnp.float32)    # OIHW
    w2 = 0.1 * jax.random.normal(kw2, (C, C, 3, 3), jnp.float32)    # OIHW
    g1 = 1.0 + 0.1 * jax.random.normal(kg1, (C,), jnp.float32)
    b1 = 0.1 * jax.random.normal(kb1, (C,), jnp.float32)
    g2 = 1.0 + 0.1 * jax.random.normal(kg2, (C,), jnp.float32)
    b2 = 0.1 * jax.random.normal(kb2, (C,), jnp.float32)

    out = jax.block_until_ready(residual_block(x, w1, g1, b1, w2, g2, b2))
    ref = jax.block_until_ready(_reference(x, w1, g1, b1, w2, g2, b2))

    assert out.shape == (B, C, H, W)
    assert jnp.allclose(out, ref, atol=1e-2, rtol=1e-2), (
        f"max abs err {jnp.max(jnp.abs(out - ref))}")

    print("KERNEL_OK")
</pallas_src>

<mosaic_0001>
module attributes {stable_mosaic.version = 11 : i64} {
  func.func @_residual_block_kernel(%arg0: i32, %arg1: memref<1x4x256xf32, #tpu.memory_space<vmem>>, %arg2: memref<9x1x256xf32, #tpu.memory_space<vmem>>, %arg3: memref<3x3x4x4xf32, #tpu.memory_space<vmem>>, %arg4: memref<4x1xf32, #tpu.memory_space<vmem>>, %arg5: memref<4x1xf32, #tpu.memory_space<vmem>>, %arg6: memref<3x3x4x4xf32, #tpu.memory_space<vmem>>, %arg7: memref<4x1xf32, #tpu.memory_space<vmem>>, %arg8: memref<4x1xf32, #tpu.memory_space<vmem>>, %arg9: memref<1x4x256xf32, #tpu.memory_space<vmem>>) attributes {dimension_semantics = [#tpu.dimension_semantics<parallel>], iteration_bounds = array<i64: 2>, scalar_prefetch = 0 : i64, scratch_operands = 0 : i64, tpu.core_type = #tpu.core_type<tc>, window_params = [{transform_indices = @transform_0, window_bounds = array<i64: 1, 4, 256>}, {pipeline_mode = #tpu.pipeline_mode<synchronous>, transform_indices = @transform_1, window_bounds = array<i64: 9, 1, 256>}, {pipeline_mode = #tpu.pipeline_mode<synchronous>, transform_indices = @transform_2, window_bounds = array<i64: 3, 3, 4, 4>}, {pipeline_mode = #tpu.pipeline_mode<synchronous>, transform_indices = @transform_3, window_bounds = array<i64: 4, 1>}, {pipeline_mode = #tpu.pipeline_mode<synchronous>, transform_indices = @transform_4, window_bounds = array<i64: 4, 1>}, {pipeline_mode = #tpu.pipeline_mode<synchronous>, transform_indices = @transform_5, window_bounds = array<i64: 3, 3, 4, 4>}, {pipeline_mode = #tpu.pipeline_mode<synchronous>, transform_indices = @transform_6, window_bounds = array<i64: 4, 1>}, {pipeline_mode = #tpu.pipeline_mode<synchronous>, transform_indices = @transform_7, window_bounds = array<i64: 4, 1>}, {transform_indices = @transform_8, window_bounds = array<i64: 1, 4, 256>}]} {
    %c0 = arith.constant 0 : index
    %c0_0 = arith.constant 0 : index
    %c0_1 = arith.constant 0 : index
    %0 = vector.load %arg2[%c0, %c0_0, %c0_1] : memref<9x1x256xf32, #tpu.memory_space<vmem>>, vector<1x1x256xf32>
    %1 = vector.shape_cast %0 : vector<1x1x256xf32> to vector<1x256xf32>
    %c1 = arith.constant 1 : index
    %c0_2 = arith.constant 0 : index
    %c0_3 = arith.constant 0 : index
    %2 = vector.load %arg2[%c1, %c0_2, %c0_3] : memref<9x1x256xf32, #tpu.memory_space<vmem>>, vector<1x1x256xf32>
    %3 = vector.shape_cast %2 : vector<1x1x256xf32> to vector<1x256xf32>
    %c2 = arith.constant 2 : index
    %c0_4 = arith.constant 0 : index
    %c0_5 = arith.constant 0 : index
    %4 = vector.load %arg2[%c2, %c0_4, %c0_5] : memref<9x1x256xf32, #tpu.memory_space<vmem>>, vector<1x1x256xf32>
    %5 = vector.shape_cast %4 : vector<1x1x256xf32> to vector<1x256xf32>
    %c3 = arith.constant 3 : index
    %c0_6 = arith.constant 0 : index
    %c0_7 = arith.constant 0 : index
    %6 = vector.load %arg2[%c3, %c0_6, %c0_7] : memref<9x1x256xf32, #tpu.memory_space<vmem>>, vector<1x1x256xf32>
    %7 = vector.shape_cast %6 : vector<1x1x256xf32> to vector<1x256xf32>
    %c5 = arith.constant 5 : index
    %c0_8 = arith.constant 0 : index
    %c0_9 = arith.constant 0 : index
    %8 = vector.load %arg2[%c5, %c0_8, %c0_9] : memref<9x1x256xf32, #tpu.memory_space<vmem>>, vector<1x1x256xf32>
    %9 = vector.shape_cast %8 : vector<1x1x256xf32> to vector<1x256xf32>
    %c6 = arith.constant 6 : index
    %c0_10 = arith.constant 0 : index
    %c0_11 = arith.constant 0 : index
    %10 = vector.load %arg2[%c6, %c0_10, %c0_11] : memref<9x1x256xf32, #tpu.memory_space<vmem>>, vector<1x1x256xf32>
    %11 = vector.shape_cast %10 : vector<1x1x256xf32> to vector<1x256xf32>
    %c7 = arith.constant 7 : index
    %c0_12 = arith.constant 0 : index
    %c0_13 = arith.constant 0 : index
    %12 = vector.load %arg2[%c7, %c0_12, %c0_13] : memref<9x1x256xf32, #tpu.memory_space<vmem>>, vector<1x1x256xf32>
    %13 = vector.shape_cast %12 : vector<1x1x256xf32> to vector<1x256xf32>
    %c8 = arith.constant 8 : index
    %c0_14 = arith.constant 0 : index
    %c0_15 = arith.constant 0 : index
    %14 = vector.load %arg2[%c8, %c0_14, %c0_15] : memref<9x1x256xf32, #tpu.memory_space<vmem>>, vector<1x1x256xf32>
    %15 = vector.shape_cast %14 : vector<1x1x256xf32> to vector<1x256xf32>
    %c0_16 = arith.constant 0 : index
    %c0_17 = arith.constant 0 : index
    %c0_18 = arith.constant 0 : index
    %c0_19 = arith.constant 0 : index
    %16 = vector.load %arg3[%c0_16, %c0_17, %c0_18, %c0_19] : memref<3x3x4x4xf32, #tpu.memory_space<vmem>>, vector<1x1x4x4xf32>
    %17 = vector.shape_cast %16 : vector<1x1x4x4xf32> to vector<4x4xf32>
    %c0_20 = arith.constant 0 : index
    %c1_21 = arith.constant 1 : index
    %c0_22 = arith.constant 0 : index
    %c0_23 = arith.constant 0 : index
    %18 = vector.load %arg3[%c0_20, %c1_21, %c0_22, %c0_23] : memref<3x3x4x4xf32, #tpu.memory_space<vmem>>, vector<1x1x4x4xf32>
    %19 = vector.shape_cast %18 : vector<1x1x4x4xf32> to vector<4x4xf32>
    %c0_24 = arith.constant 0 : index
    %c2_25 = arith.constant 2 : index
    %c0_26 = arith.constant 0 : index
    %c0_27 = arith.constant 0 : index
    %20 = vector.load %arg3[%c0_24, %c2_25, %c0_26, %c0_27] : memref<3x3x4x4xf32, #tpu.memory_space<vmem>>, vector<1x1x4x4xf32>
    %21 = vector.shape_cast %20 : vector<1x1x4x4xf32> to vector<4x4xf32>
    %c1_28 = arith.constant 1 : index
    %c0_29 = arith.constant 0 : index
    %c0_30 = arith.constant 0 : index
    %c0_31 = arith.constant 0 : index
    %22 = vector.load %arg3[%c1_28, %c0_29, %c0_30, %c0_31] : memref<3x3x4x4xf32, #tpu.memory_space<vmem>>, vector<1x1x4x4xf32>
    %23 = vector.shape_cast %22 : vector<1x1x4x4xf32> to vector<4x4xf32>
    %c1_32 = arith.constant 1 : index
    %c1_33 = arith.constant 1 : index
    %c0_34 = arith.constant 0 : index
    %c0_35 = arith.constant 0 : index
    %24 = vector.load %arg3[%c1_32, %c1_33, %c0_34, %c0_35] : memref<3x3x4x4xf32, #tpu.memory_space<vmem>>, vector<1x1x4x4xf32>
    %25 = vector.shape_cast %24 : vector<1x1x4x4xf32> to vector<4x4xf32>
    %c1_36 = arith.constant 1 : index
    %c2_37 = arith.constant 2 : index
    %c0_38 = arith.constant 0 : index
    %c0_39 = arith.constant 0 : index
    %26 = vector.load %arg3[%c1_36, %c2_37, %c0_38, %c0_39] : memref<3x3x4x4xf32, #tpu.memory_space<vmem>>, vector<1x1x4x4xf32>
    %27 = vector.shape_cast %26 : vector<1x1x4x4xf32> to vector<4x4xf32>
    %c2_40 = arith.constant 2 : index
    %c0_41 = arith.constant 0 : index
    %c0_42 = arith.constant 0 : index
    %c0_43 = arith.constant 0 : index
    %28 = vector.load %arg3[%c2_40, %c0_41, %c0_42, %c0_43] : memref<3x3x4x4xf32, #tpu.memory_space<vmem>>, vector<1x1x4x4xf32>
    %29 = vector.shape_cast %28 : vector<1x1x4x4xf32> to vector<4x4xf32>
    %c2_44 = arith.constant 2 : index
    %c1_45 = arith.constant 1 : index
    %c0_46 = arith.constant 0 : index
    %c0_47 = arith.constant 0 : index
    %30 = vector.load %arg3[%c2_44, %c1_45, %c0_46, %c0_47] : memref<3x3x4x4xf32, #tpu.memory_space<vmem>>, vector<1x1x4x4xf32>
    %31 = vector.shape_cast %30 : vector<1x1x4x4xf32> to vector<4x4xf32>
    %c2_48 = arith.constant 2 : index
    %c2_49 = arith.constant 2 : index
    %c0_50 = arith.constant 0 : index
    %c0_51 = arith.constant 0 : index
    %32 = vector.load %arg3[%c2_48, %c2_49, %c0_50, %c0_51] : memref<3x3x4x4xf32, #tpu.memory_space<vmem>>, vector<1x1x4x4xf32>
    %33 = vector.shape_cast %32 : vector<1x1x4x4xf32> to vector<4x4xf32>
    %c0_52 = arith.constant 0 : index
    %c0_53 = arith.constant 0 : index
    %c0_54 = arith.constant 0 : index
    %c0_55 = arith.constant 0 : index
    %34 = vector.load %arg6[%c0_52, %c0_53, %c0_54, %c0_55] : memref<3x3x4x4xf32, #tpu.memory_space<vmem>>, vector<1x1x4x4xf32>
    %35 = vector.shape_cast %34 : vector<1x1x4x4xf32> to vector<4x4xf32>
    %c0_56 = arith.constant 0 : index
    %c1_57 = arith.constant 1 : index
    %c0_58 = arith.constant 0 : index
    %c0_59 = arith.constant 0 : index
    %36 = vector.load %arg6[%c0_56, %c1_57, %c0_58, %c0_59] : memref<3x3x4x4xf32, #tpu.memory_space<vmem>>, vector<1x1x4x4xf32>
    %37 = vector.shape_cast %36 : vector<1x1x4x4xf32> to vector<4x4xf32>
    %c0_60 = arith.constant 0 : index
    %c2_61 = arith.constant 2 : index
    %c0_62 = arith.constant 0 : index
    %c0_63 = arith.constant 0 : index
    %38 = vector.load %arg6[%c0_60, %c2_61, %c0_62, %c0_63] : memref<3x3x4x4xf32, #tpu.memory_space<vmem>>, vector<1x1x4x4xf32>
    %39 = vector.shape_cast %38 : vector<1x1x4x4xf32> to vector<4x4xf32>
    %c1_64 = arith.constant 1 : index
    %c0_65 = arith.constant 0 : index
    %c0_66 = arith.constant 0 : index
    %c0_67 = arith.constant 0 : index
    %40 = vector.load %arg6[%c1_64, %c0_65, %c0_66, %c0_67] : memref<3x3x4x4xf32, #tpu.memory_space<vmem>>, vector<1x1x4x4xf32>
    %41 = vector.shape_cast %40 : vector<1x1x4x4xf32> to vector<4x4xf32>
    %c1_68 = arith.constant 1 : index
    %c1_69 = arith.constant 1 : index
    %c0_70 = arith.constant 0 : index
    %c0_71 = arith.constant 0 : index
    %42 = vector.load %arg6[%c1_68, %c1_69, %c0_70, %c0_71] : memref<3x3x4x4xf32, #tpu.memory_space<vmem>>, vector<1x1x4x4xf32>
    %43 = vector.shape_cast %42 : vector<1x1x4x4xf32> to vector<4x4xf32>
    %c1_72 = arith.constant 1 : index
    %c2_73 = arith.constant 2 : index
    %c0_74 = arith.constant 0 : index
    %c0_75 = arith.constant 0 : index
    %44 = vector.load %arg6[%c1_72, %c2_73, %c0_74, %c0_75] : memref<3x3x4x4xf32, #tpu.memory_space<vmem>>, vector<1x1x4x4xf32>
    %45 = vector.shape_cast %44 : vector<1x1x4x4xf32> to vector<4x4xf32>
    %c2_76 = arith.constant 2 : index
    %c0_77 = arith.constant 0 : index
    %c0_78 = arith.constant 0 : index
    %c0_79 = arith.constant 0 : index
    %46 = vector.load %arg6[%c2_76, %c0_77, %c0_78, %c0_79] : memref<3x3x4x4xf32, #tpu.memory_space<vmem>>, vector<1x1x4x4xf32>
    %47 = vector.shape_cast %46 : vector<1x1x4x4xf32> to vector<4x4xf32>
    %c2_80 = arith.constant 2 : index
    %c1_81 = arith.constant 1 : index
    %c0_82 = arith.constant 0 : index
    %c0_83 = arith.constant 0 : index
    %48 = vector.load %arg6[%c2_80, %c1_81, %c0_82, %c0_83] : memref<3x3x4x4xf32, #tpu.memory_space<vmem>>, vector<1x1x4x4xf32>
    %49 = vector.shape_cast %48 : vector<1x1x4x4xf32> to vector<4x4xf32>
    %c2_84 = arith.constant 2 : index
    %c2_85 = arith.constant 2 : index
    %c0_86 = arith.constant 0 : index
    %c0_87 = arith.constant 0 : index
    %50 = vector.load %arg6[%c2_84, %c2_85, %c0_86, %c0_87] : memref<3x3x4x4xf32, #tpu.memory_space<vmem>>, vector<1x1x4x4xf32>
    %51 = vector.shape_cast %50 : vector<1x1x4x4xf32> to vector<4x4xf32>
    %c0_88 = arith.constant 0 : index
    %c0_89 = arith.constant 0 : index
    %52 = vector.load %arg4[%c0_88, %c0_89] : memref<4x1xf32, #tpu.memory_space<vmem>>, vector<4x1xf32>
    %c0_90 = arith.constant 0 : index
    %c0_91 = arith.constant 0 : index
    %53 = vector.load %arg5[%c0_90, %c0_91] : memref<4x1xf32, #tpu.memory_space<vmem>>, vector<4x1xf32>
    %c0_92 = arith.constant 0 : index
    %c0_93 = arith.constant 0 : index
    %54 = vector.load %arg7[%c0_92, %c0_93] : memref<4x1xf32, #tpu.memory_space<vmem>>, vector<4x1xf32>
    %c0_94 = arith.constant 0 : index
    %c0_95 = arith.constant 0 : index
    %55 = vector.load %arg8[%c0_94, %c0_95] : memref<4x1xf32, #tpu.memory_space<vmem>>, vector<4x1xf32>
    %c0_96 = arith.constant 0 : index
    %c0_97 = arith.constant 0 : index
    %c0_98 = arith.constant 0 : index
    %56 = vector.load %arg1[%c0_96, %c0_97, %c0_98] : memref<1x4x256xf32, #tpu.memory_space<vmem>>, vector<1x4x256xf32>
    %57 = vector.shape_cast %56 : vector<1x4x256xf32> to vector<4x256xf32>
    %c17_i32 = arith.constant 17 : i32
    %58 = tpu.dynamic_rotate %57 by %c17_i32 dim 1 : vector<4x256xf32>, i32 -> vector<4x256xf32>
    %59 = vector.broadcast %1 : vector<1x256xf32> to vector<4x256xf32>
    %60 = arith.mulf %58, %59 : vector<4x256xf32>
    %cst = arith.constant dense<0.000000e+00> : vector<4x256xf32>
    %61 = tpu.matmul %17, %60, %cst {dimension_numbers = #tpu.dot_dimension_numbers<[1], [0], [0], [1], [0, 0, 1, 1], [], []>} : vector<4x4xf32>, vector<4x256xf32>, vector<4x256xf32> -> vector<4x256xf32>
    %c16_i32 = arith.constant 16 : i32
    %62 = tpu.dynamic_rotate %57 by %c16_i32 dim 1 : vector<4x256xf32>, i32 -> vector<4x256xf32>
    %63 = vector.broadcast %3 : vector<1x256xf32> to vector<4x256xf32>
    %64 = arith.mulf %62, %63 : vector<4x256xf32>
    %cst_99 = arith.constant dense<0.000000e+00> : vector<4x256xf32>
    %65 = tpu.matmul %19, %64, %cst_99 {dimension_numbers = #tpu.dot_dimension_numbers<[1], [0], [0], [1], [0, 0, 1, 1], [], []>} : vector<4x4xf32>, vector<4x256xf32>, vector<4x256xf32> -> vector<4x256xf32>
    %66 = arith.addf %61, %65 : vector<4x256xf32>
    %c15_i32 = arith.constant 15 : i32
    %67 = tpu.dynamic_rotate %57 by %c15_i32 dim 1 : vector<4x256xf32>, i32 -> vector<4x256xf32>
    %68 = vector.broadcast %5 : vector<1x256xf32> to vector<4x256xf32>
    %69 = arith.mulf %67, %68 : vector<4x256xf32>
    %cst_100 = arith.constant dense<0.000000e+00> : vector<4x256xf32>
    %70 = tpu.matmul %21, %69, %cst_100 {dimension_numbers = #tpu.dot_dimension_numbers<[1], [0], [0], [1], [0, 0, 1, 1], [], []>} : vector<4x4xf32>, vector<4x256xf32>, vector<4x256xf32> -> vector<4x256xf32>
    %71 = arith.addf %66, %70 : vector<4x256xf32>
    %c1_i32 = arith.constant 1 : i32
    %72 = tpu.dynamic_rotate %57 by %c1_i32 dim 1 : vector<4x256xf32>, i32 -> vector<4x256xf32>
    %73 = vector.broadcast %7 : vector<1x256xf32> to vector<4x256xf32>
    %74 = arith.mulf %72, %73 : vector<4x256xf32>
    %cst_101 = arith.constant dense<0.000000e+00> : vector<4x256xf32>
    %75 = tpu.matmul %23, %74, %cst_101 {dimension_numbers = #tpu.dot_dimension_numbers<[1], [0], [0], [1], [0, 0, 1, 1], [], []>} : vector<4x4xf32>, vector<4x256xf32>, vector<4x256xf32> -> vector<4x256xf32>
    %76 = arith.addf %71, %75 : vector<4x256xf32>
    %cst_102 = arith.constant dense<0.000000e+00> : vector<4x256xf32>
    %77 = tpu.matmul %25, %57, %cst_102 {dimension_numbers = #tpu.dot_dimension_numbers<[1], [0], [0], [1], [0, 0, 1, 1], [], []>} : vector<4x4xf32>, vector<4x256xf32>, vector<4x256xf32> -> vector<4x256xf32>
    %78 = arith.addf %76, %77 : vector<4x256xf32>
    %c255_i32 = arith.constant 255 : i32
    %79 = tpu.dynamic_rotate %57 by %c255_i32 dim 1 : vector<4x256xf32>, i32 -> vector<4x256xf32>
    %80 = vector.broadcast %9 : vector<1x256xf32> to vector<4x256xf32>
    %81 = arith.mulf %79, %80 : vector<4x256xf32>
    %cst_103 = arith.constant dense<0.000000e+00> : vector<4x256xf32>
    %82 = tpu.matmul %27, %81, %cst_103 {dimension_numbers = #tpu.dot_dimension_numbers<[1], [0], [0], [1], [0, 0, 1, 1], [], []>} : vector<4x4xf32>, vector<4x256xf32>, vector<4x256xf32> -> vector<4x256xf32>
    %83 = arith.addf %78, %82 : vector<4x256xf32>
    %c241_i32 = arith.constant 241 : i32
    %84 = tpu.dynamic_rotate %57 by %c241_i32 dim 1 : vector<4x256xf32>, i32 -> vector<4x256xf32>
    %85 = vector.broadcast %11 : vector<1x256xf32> to vector<4x256xf32>
    %86 = arith.mulf %84, %85 : vector<4x256xf32>
    %cst_104 = arith.constant dense<0.000000e+00> : vector<4x256xf32>
    %87 = tpu.matmul %29, %86, %cst_104 {dimension_numbers = #tpu.dot_dimension_numbers<[1], [0], [0], [1], [0, 0, 1, 1], [], []>} : vector<4x4xf32>, vector<4x256xf32>, vector<4x256xf32> -> vector<4x256xf32>
    %88 = arith.addf %83, %87 : vector<4x256xf32>
    %c240_i32 = arith.constant 240 : i32
    %89 = tpu.dynamic_rotate %57 by %c240_i32 dim 1 : vector<4x256xf32>, i32 -> vector<4x256xf32>
    %90 = vector.broadcast %13 : vector<1x256xf32> to vector<4x256xf32>
    %91 = arith.mulf %89, %90 : vector<4x256xf32>
    %cst_105 = arith.constant dense<0.000000e+00> : vector<4x256xf32>
    %92 = tpu.matmul %31, %91, %cst_105 {dimension_numbers = #tpu.dot_dimension_numbers<[1], [0], [0], [1], [0, 0, 1, 1], [], []>} : vector<4x4xf32>, vector<4x256xf32>, vector<4x256xf32> -> vector<4x256xf32>
    %93 = arith.addf %88, %92 : vector<4x256xf32>
    %c239_i32 = arith.constant 239 : i32
    %94 = tpu.dynamic_rotate %57 by %c239_i32 dim 1 : vector<4x256xf32>, i32 -> vector<4x256xf32>
    %95 = vector.broadcast %15 : vector<1x256xf32> to vector<4x256xf32>
    %96 = arith.mulf %94, %95 : vector<4x256xf32>
    %cst_106 = arith.constant dense<0.000000e+00> : vector<4x256xf32>
    %97 = tpu.matmul %33, %96, %cst_106 {dimension_numbers = #tpu.dot_dimension_numbers<[1], [0], [0], [1], [0, 0, 1, 1], [], []>} : vector<4x4xf32>, vector<4x256xf32>, vector<4x256xf32> -> vector<4x256xf32>
    %98 = arith.addf %93, %97 : vector<4x256xf32>
    %cst_107 = arith.constant dense<0.000000e+00> : vector<4xf32>
    %99 = vector.multi_reduction <add>, %98, %cst_107 [1] : vector<4x256xf32> to vector<4xf32>
    %100 = vector.shape_cast %99 : vector<4xf32> to vector<4x1xf32>
    %cst_108 = arith.constant 3.906250e-03 : f32
    %101 = vector.broadcast %cst_108 : f32 to vector<4x1xf32>
    %102 = arith.mulf %100, %101 : vector<4x1xf32>
    %103 = arith.mulf %98, %98 : vector<4x256xf32>
    %cst_109 = arith.constant dense<0.000000e+00> : vector<4xf32>
    %104 = vector.multi_reduction <add>, %103, %cst_109 [1] : vector<4x256xf32> to vector<4xf32>
    %105 = vector.shape_cast %104 : vector<4xf32> to vector<4x1xf32>
    %cst_110 = arith.constant 3.906250e-03 : f32
    %106 = vector.broadcast %cst_110 : f32 to vector<4x1xf32>
    %107 = arith.mulf %105, %106 : vector<4x1xf32>
    %108 = arith.mulf %102, %102 : vector<4x1xf32>
    %109 = arith.subf %107, %108 : vector<4x1xf32>
    %110 = vector.broadcast %102 : vector<4x1xf32> to vector<4x256xf32>
    %111 = arith.subf %98, %110 : vector<4x256xf32>
    %cst_111 = arith.constant 9.99999974E-6 : f32
    %112 = vector.broadcast %cst_111 : f32 to vector<4x1xf32>
    %113 = arith.addf %109, %112 : vector<4x1xf32>
    %114 = math.rsqrt %113 : vector<4x1xf32>
    %115 = vector.broadcast %114 : vector<4x1xf32> to vector<4x256xf32>
    %116 = arith.mulf %111, %115 : vector<4x256xf32>
    %117 = vector.broadcast %52 : vector<4x1xf32> to vector<4x256xf32>
    %118 = arith.mulf %116, %117 : vector<4x256xf32>
    %119 = vector.broadcast %53 : vector<4x1xf32> to vector<4x256xf32>
    %120 = arith.addf %118, %119 : vector<4x256xf32>
    %cst_112 = arith.constant 0.000000e+00 : f32
    %121 = vector.broadcast %cst_112 : f32 to vector<4x256xf32>
    %122 = arith.maximumf %120, %121 : vector<4x256xf32>
    %c17_i32_113 = arith.constant 17 : i32
    %123 = tpu.dynamic_rotate %122 by %c17_i32_113 dim 1 : vector<4x256xf32>, i32 -> vector<4x256xf32>
    %124 = vector.broadcast %1 : vector<1x256xf32> to vector<4x256xf32>
    %125 = arith.mulf %123, %124 : vector<4x256xf32>
    %cst_114 = arith.constant dense<0.000000e+00> : vector<4x256xf32>
    %126 = tpu.matmul %35, %125, %cst_114 {dimension_numbers = #tpu.dot_dimension_numbers<[1], [0], [0], [1], [0, 0, 1, 1], [], []>} : vector<4x4xf32>, vector<4x256xf32>, vector<4x256xf32> -> vector<4x256xf32>
    %c16_i32_115 = arith.constant 16 : i32
    %127 = tpu.dynamic_rotate %122 by %c16_i32_115 dim 1 : vector<4x256xf32>, i32 -> vector<4x256xf32>
    %128 = vector.broadcast %3 : vector<1x256xf32> to vector<4x256xf32>
    %129 = arith.mulf %127, %128 : vector<4x256xf32>
    %cst_116 = arith.constant dense<0.000000e+00> : vector<4x256xf32>
    %130 = tpu.matmul %37, %129, %cst_116 {dimension_numbers = #tpu.dot_dimension_numbers<[1], [0], [0], [1], [0, 0, 1, 1], [], []>} : vector<4x4xf32>, vector<4x256xf32>, vector<4x256xf32> -> vector<4x256xf32>
    %131 = arith.addf %126, %130 : vector<4x256xf32>
    %c15_i32_117 = arith.constant 15 : i32
    %132 = tpu.dynamic_rotate %122 by %c15_i32_117 dim 1 : vector<4x256xf32>, i32 -> vector<4x256xf32>
    %133 = vector.broadcast %5 : vector<1x256xf32> to vector<4x256xf32>
    %134 = arith.mulf %132, %133 : vector<4x256xf32>
    %cst_118 = arith.constant dense<0.000000e+00> : vector<4x256xf32>
    %135 = tpu.matmul %39, %134, %cst_118 {dimension_numbers = #tpu.dot_dimension_numbers<[1], [0], [0], [1], [0, 0, 1, 1], [], []>} : vector<4x4xf32>, vector<4x256xf32>, vector<4x256xf32> -> vector<4x256xf32>
    %136 = arith.addf %131, %135 : vector<4x256xf32>
    %c1_i32_119 = arith.constant 1 : i32
    %137 = tpu.dynamic_rotate %122 by %c1_i32_119 dim 1 : vector<4x256xf32>, i32 -> vector<4x256xf32>
    %138 = vector.broadcast %7 : vector<1x256xf32> to vector<4x256xf32>
    %139 = arith.mulf %137, %138 : vector<4x256xf32>
    %cst_120 = arith.constant dense<0.000000e+00> : vector<4x256xf32>
    %140 = tpu.matmul %41, %139, %cst_120 {dimension_numbers = #tpu.dot_dimension_numbers<[1], [0], [0], [1], [0, 0, 1, 1], [], []>} : vector<4x4xf32>, vector<4x256xf32>, vector<4x256xf32> -> vector<4x256xf32>
    %141 = arith.addf %136, %140 : vector<4x256xf32>
    %cst_121 = arith.constant dense<0.000000e+00> : vector<4x256xf32>
    %142 = tpu.matmul %43, %122, %cst_121 {dimension_numbers = #tpu.dot_dimension_numbers<[1], [0], [0], [1], [0, 0, 1, 1], [], []>} : vector<4x4xf32>, vector<4x256xf32>, vector<4x256xf32> -> vector<4x256xf32>
    %143 = arith.addf %141, %142 : vector<4x256xf32>
    %c255_i32_122 = arith.constant 255 : i32
    %144 = tpu.dynamic_rotate %122 by %c255_i32_122 dim 1 : vector<4x256xf32>, i32 -> vector<4x256xf32>
    %145 = vector.broadcast %9 : vector<1x256xf32> to vector<4x256xf32>
    %146 = arith.mulf %144, %145 : vector<4x256xf32>
    %cst_123 = arith.constant dense<0.000000e+00> : vector<4x256xf32>
    %147 = tpu.matmul %45, %146, %cst_123 {dimension_numbers = #tpu.dot_dimension_numbers<[1], [0], [0], [1], [0, 0, 1, 1], [], []>} : vector<4x4xf32>, vector<4x256xf32>, vector<4x256xf32> -> vector<4x256xf32>
    %148 = arith.addf %143, %147 : vector<4x256xf32>
    %c241_i32_124 = arith.constant 241 : i32
    %149 = tpu.dynamic_rotate %122 by %c241_i32_124 dim 1 : vector<4x256xf32>, i32 -> vector<4x256xf32>
    %150 = vector.broadcast %11 : vector<1x256xf32> to vector<4x256xf32>
    %151 = arith.mulf %149, %150 : vector<4x256xf32>
    %cst_125 = arith.constant dense<0.000000e+00> : vector<4x256xf32>
    %152 = tpu.matmul %47, %151, %cst_125 {dimension_numbers = #tpu.dot_dimension_numbers<[1], [0], [0], [1], [0, 0, 1, 1], [], []>} : vector<4x4xf32>, vector<4x256xf32>, vector<4x256xf32> -> vector<4x256xf32>
    %153 = arith.addf %148, %152 : vector<4x256xf32>
    %c240_i32_126 = arith.constant 240 : i32
    %154 = tpu.dynamic_rotate %122 by %c240_i32_126 dim 1 : vector<4x256xf32>, i32 -> vector<4x256xf32>
    %155 = vector.broadcast %13 : vector<1x256xf32> to vector<4x256xf32>
    %156 = arith.mulf %154, %155 : vector<4x256xf32>
    %cst_127 = arith.constant dense<0.000000e+00> : vector<4x256xf32>
    %157 = tpu.matmul %49, %156, %cst_127 {dimension_numbers = #tpu.dot_dimension_numbers<[1], [0], [0], [1], [0, 0, 1, 1], [], []>} : vector<4x4xf32>, vector<4x256xf32>, vector<4x256xf32> -> vector<4x256xf32>
    %158 = arith.addf %153, %157 : vector<4x256xf32>
    %c239_i32_128 = arith.constant 239 : i32
    %159 = tpu.dynamic_rotate %122 by %c239_i32_128 dim 1 : vector<4x256xf32>, i32 -> vector<4x256xf32>
    %160 = vector.broadcast %15 : vector<1x256xf32> to vector<4x256xf32>
    %161 = arith.mulf %159, %160 : vector<4x256xf32>
    %cst_129 = arith.constant dense<0.000000e+00> : vector<4x256xf32>
    %162 = tpu.matmul %51, %161, %cst_129 {dimension_numbers = #tpu.dot_dimension_numbers<[1], [0], [0], [1], [0, 0, 1, 1], [], []>} : vector<4x4xf32>, vector<4x256xf32>, vector<4x256xf32> -> vector<4x256xf32>
    %163 = arith.addf %158, %162 : vector<4x256xf32>
    %cst_130 = arith.constant dense<0.000000e+00> : vector<4xf32>
    %164 = vector.multi_reduction <add>, %163, %cst_130 [1] : vector<4x256xf32> to vector<4xf32>
    %165 = vector.shape_cast %164 : vector<4xf32> to vector<4x1xf32>
    %cst_131 = arith.constant 3.906250e-03 : f32
    %166 = vector.broadcast %cst_131 : f32 to vector<4x1xf32>
    %167 = arith.mulf %165, %166 : vector<4x1xf32>
    %168 = arith.mulf %163, %163 : vector<4x256xf32>
    %cst_132 = arith.constant dense<0.000000e+00> : vector<4xf32>
    %169 = vector.multi_reduction <add>, %168, %cst_132 [1] : vector<4x256xf32> to vector<4xf32>
    %170 = vector.shape_cast %169 : vector<4xf32> to vector<4x1xf32>
    %cst_133 = arith.constant 3.906250e-03 : f32
    %171 = vector.broadcast %cst_133 : f32 to vector<4x1xf32>
    %172 = arith.mulf %170, %171 : vector<4x1xf32>
    %173 = arith.mulf %167, %167 : vector<4x1xf32>
    %174 = arith.subf %172, %173 : vector<4x1xf32>
    %175 = vector.broadcast %167 : vector<4x1xf32> to vector<4x256xf32>
    %176 = arith.subf %163, %175 : vector<4x256xf32>
    %cst_134 = arith.constant 9.99999974E-6 : f32
    %177 = vector.broadcast %cst_134 : f32 to vector<4x1xf32>
    %178 = arith.addf %174, %177 : vector<4x1xf32>
    %179 = math.rsqrt %178 : vector<4x1xf32>
    %180 = vector.broadcast %179 : vector<4x1xf32> to vector<4x256xf32>
    %181 = arith.mulf %176, %180 : vector<4x256xf32>
    %182 = vector.broadcast %54 : vector<4x1xf32> to vector<4x256xf32>
    %183 = arith.mulf %181, %182 : vector<4x256xf32>
    %184 = vector.broadcast %55 : vector<4x1xf32> to vector<4x256xf32>
    %185 = arith.addf %183, %184 : vector<4x256xf32>
    %186 = arith.addf %57, %185 : vector<4x256xf32>
    %c0_135 = arith.constant 0 : index
    %c0_136 = arith.constant 0 : index
    %c0_137 = arith.constant 0 : index
    %187 = vector.load %arg9[%c0_135, %c0_136, %c0_137] : memref<1x4x256xf32, #tpu.memory_space<vmem>>, vector<1x4x256xf32>
    %188 = vector.shape_cast %187 : vector<1x4x256xf32> to vector<4x256xf32>
    %189 = vector.shape_cast %186 : vector<4x256xf32> to vector<1x4x256xf32>
    tpu.vector_store %arg9[%c0_135, %c0_136, %c0_137], %189 {strides = array<i32>} : memref<1x4x256xf32, #tpu.memory_space<vmem>>, vector<1x4x256xf32>,
    return
  }
  func.func @transform_0(%arg0: i32) -> (i32, i32, i32) {
    %c0_i32 = arith.constant 0 : i32
    %c0_i32_0 = arith.constant 0 : i32
    %c0_i32_1 = arith.constant 0 : i32
    return %arg0, %c0_i32, %c0_i32_0 : i32, i32, i32
  }
  func.func @transform_1(%arg0: i32) -> (i32, i32, i32) {
    %c0_i32 = arith.constant 0 : i32
    %c0_i32_0 = arith.constant 0 : i32
    %c0_i32_1 = arith.constant 0 : i32
    %c0_i32_2 = arith.constant 0 : i32
    return %c0_i32, %c0_i32_0, %c0_i32_1 : i32, i32, i32
  }
  func.func @transform_2(%arg0: i32) -> (i32, i32, i32, i32) {
    %c0_i32 = arith.constant 0 : i32
    %c0_i32_0 = arith.constant 0 : i32
    %c0_i32_1 = arith.constant 0 : i32
    %c0_i32_2 = arith.constant 0 : i32
    %c0_i32_3 = arith.constant 0 : i32
    return %c0_i32, %c0_i32_0, %c0_i32_1, %c0_i32_2 : i32, i32, i32, i32
  }
  func.func @transform_3(%arg0: i32) -> (i32, i32) {
    %c0_i32 = arith.constant 0 : i32
    %c0_i32_0 = arith.constant 0 : i32
    %c0_i32_1 = arith.constant 0 : i32
    return %c0_i32, %c0_i32_0 : i32, i32
  }
  func.func @transform_4(%arg0: i32) -> (i32, i32) {
    %c0_i32 = arith.constant 0 : i32
    %c0_i32_0 = arith.constant 0 : i32
    %c0_i32_1 = arith.constant 0 : i32
    return %c0_i32, %c0_i32_0 : i32, i32
  }
  func.func @transform_5(%arg0: i32) -> (i32, i32, i32, i32) {
    %c0_i32 = arith.constant 0 : i32
    %c0_i32_0 = arith.constant 0 : i32
    %c0_i32_1 = arith.constant 0 : i32
    %c0_i32_2 = arith.constant 0 : i32
    %c0_i32_3 = arith.constant 0 : i32
    return %c0_i32, %c0_i32_0, %c0_i32_1, %c0_i32_2 : i32, i32, i32, i32
  }
  func.func @transform_6(%arg0: i32) -> (i32, i32) {
    %c0_i32 = arith.constant 0 : i32
    %c0_i32_0 = arith.constant 0 : i32
    %c0_i32_1 = arith.constant 0 : i32
    return %c0_i32, %c0_i32_0 : i32, i32
  }
  func.func @transform_7(%arg0: i32) -> (i32, i32) {
    %c0_i32 = arith.constant 0 : i32
    %c0_i32_0 = arith.constant 0 : i32
    %c0_i32_1 = arith.constant 0 : i32
    return %c0_i32, %c0_i32_0 : i32, i32
  }
  func.func @transform_8(%arg0: i32) -> (i32, i32, i32) {
    %c0_i32 = arith.constant 0 : i32
    %c0_i32_0 = arith.constant 0 : i32
    %c0_i32_1 = arith.constant 0 : i32
    return %arg0, %c0_i32, %c0_i32_0 : i32, i32, i32
  }
}

</mosaic_0001>

<bundles_post_ra>
// kernel: tpu_custom_call.1
= control target key start
LH: loop header
LB: loop body
LE: loop exit
PB: predicated region body
PF: predicated region fallthrough
CT: control target
= control target key end

     0   :  { %13 = vsyncpa [#allocation3], 0  ;;  %s3287_s0 = inlined_call_operand.hbm [shape: f32[2,4,256], index: 0, kind: input, shape index: {}]   ;;  %s3288_s1 = inlined_call_operand.hbm [shape: f32[9,1,256], index: 1, kind: input, shape index: {}]   ;;  %s3289_s2 = inlined_call_operand.hbm [shape: f32[3,3,4,4], index: 2, kind: input, shape index: {}]   ;;  %s3290_s3 = inlined_call_operand.vmem [shape: f32[4,1], index: 3, kind: input, shape index: {}]   ;;  %s3291_s4 = inlined_call_operand.vmem [shape: f32[4,1], index: 4, kind: input, shape index: {}]   ;;  %s3292_s5 = inlined_call_operand.vmem [shape: f32[3,3,4,4], index: 5, kind: input, shape index: {}]   ;;  %s3293_s6 = inlined_call_operand.vmem [shape: f32[4,1], index: 6, kind: input, shape index: {}]   ;;  %s3294_s7 = inlined_call_operand.vmem [shape: f32[4,1], index: 7, kind: input, shape index: {}]   ;;  %s3295_s8 = inlined_call_operand.hbm [shape: f32[2,4,256], index: 8, kind: output, shape index: {}]  }
   0x1   :  { %15 = vsyncpa [#allocation3 + $0x1], 0 }
   0x2   :  { %16 = vsyncpa [#allocation6], 0 }
   0x3   :  { %17 = vsyncpa [#allocation4], 0 }
   0x4   :  { %19 = vsyncpa [#allocation4 + $0x1], 0  ;;  %s2709_s27 = smov 0   ;;  %s2711_s28 = smov 0  }
   0x5   :  { %s2713_s29 = smov 0   ;;  %s2715_s30 = smov 0  }
   0x6 LB: > { %s2730_s9 = sadd.s32 4294967295, %s2644_s30   ;;  %s2286_s10 = sadd.s32 4294967294, %s2644_s30   ;;  %s2644_s30 = sphi %s2715_s30, %s3317_s30   ;;  %s2640_s29 = sphi %s2713_s29, %s3316_s29   ;;  %s2636_s28 = sphi %s2711_s28, %s3315_s28   ;;  %s2632_s27 = sphi %s2709_s27, %s3314_s27  }
   0x7   : > { %p45_p0 = scmp.ne.s32.totalorder %s2636_s28, %s2632_s27  ;;  %p3296_p1 = scmp.eq.s32.totalorder %s2730_s9, 0 }
   0x8   : > { %p222_p3 = scmp.eq.s32.totalorder %s2286_s10, 1  ;;  %p2287_p5 = scmp.ge.s32.totalorder %s2644_s30, 1 }
   0x9   : > { %p2739_p4 = por %p3296_p1, %p45_p0  ;;  %p229_p7 = scmp.lt.s32.totalorder %s2644_s30, 3 }
   0xa   : > { %p2744_p6 = por %p222_p3, %p45_p0  ;;  %s2646_s14 = smov [#allocation5]  }
   0xb   : > { %s3300_s11 = scalar_select %p2739_p4, 1, 0 }
   0xc   : > { %s3301_s12 = scalar_select %p2744_p6, 1, 0 }
   0xd   : > { %p2749_p8 = pnand %p2287_p5, %p229_p7  ;;  %s241_s15 = sshll.u32 %s2646_s14, 4  ;;  %s2753_s15 = int_to_ptr.vmem [resolvable:$true] %s241_s15 }
   0xe   : > { %s2647_s17 = smov [#allocation7]   ;;  %s2488_s21 = scalar_lea.hbm %s3288_s1, 288 }
   0xf   : > { %p2412_p9 = pneg %p2749_p8  ;;  %s254_s18 = sshll.u32 %s2647_s17, 4  ;;  %s2764_s18 = int_to_ptr.vmem [resolvable:$true] %s254_s18 }
  0x10   : > { %p2489_p12 = scmp.ne.s32.totalorder %s3288_s1, %s2488_s21  ;;  %p2495_p5 = scmp.lt.u32.totalorder %s2488_s21, %s3288_s1 }
  0x11   : > { %p2760_p11 = pnand %p2412_p9, %p3296_p1 }
  0x13   : > { %p2490_p13 = pneg %p2760_p11 }
  0x15   : > { %p2491_p0 = pnand %p2490_p13, %p2489_p12 }
  0x17   : > { %p2492_p3 = pneg %p2491_p0 }
  0x19   : > { %p2497_p7 = pnand %p2495_p5, %p2492_p3 }
  0x1b   : > { %2500 = shalt.err (!%p2497_p7)
}
  0x1c   : > { %s2501_s26 = scalar_lea.vmem %s2753_s15, 288  ;;  %p2509_p2 = scmp.lt.s32.totalorder %s2753_s15, %s2753_s15 }
  0x1d   : > { %p2502_p9 = scmp.ne.s32.totalorder %s2753_s15, %s2501_s26  ;;  %p2510_p12 = scmp.lt.s32.totalorder %s2501_s26, %s2501_s26 }
  0x1f   : > { %p2504_p10 = pnand %p2502_p9, %p2490_p13  ;;  %p2511_p0 = por %p2510_p12, %p2509_p2 }
  0x21   : > { %p2505_p1 = pneg %p2504_p10 }
  0x23   : > { %p2512_p6 = pnand %p2511_p0, %p2505_p1 }
  0x25   : > { %2515 = shalt.err (!%p2512_p6)
}
  0x26   : > { %s2648_s10 = smov 32   ;;  %s2649_s14 = smov 2  }
  0x27   : > { %2415 = dma.hbm_to_vmem [thread:$0]  (!%p2760_p11), %s3288_s1, 288, %s2753_s15, [#allocation6], %s2648_s10, %s2648_s10, %s2649_s14  }
  0x28   : > { %s2516_s22 = scalar_lea.hbm %s3289_s2, 576 }
  0x29   : > { %p2517_p2 = scmp.ne.s32.totalorder %s3289_s2, %s2516_s22  ;;  %p2523_p10 = scmp.lt.u32.totalorder %s2516_s22, %s3289_s2 }
  0x2b   : > { %p2519_p1 = pnand %p2517_p2, %p2490_p13 }
  0x2d   : > { %p2520_p6 = pneg %p2519_p1 }
  0x2f   : > { %p2525_p3 = pnand %p2523_p10, %p2520_p6 }
  0x31   : > { %2528 = shalt.err (!%p2525_p3)
}
  0x32   : > { %s2529_s15 = scalar_lea.vmem %s2764_s18, 576  ;;  %p2537_p12 = scmp.lt.s32.totalorder %s2764_s18, %s2764_s18 }
  0x33   : > { %p2530_p5 = scmp.ne.s32.totalorder %s2764_s18, %s2529_s15  ;;  %p2538_p0 = scmp.lt.s32.totalorder %s2529_s15, %s2529_s15 }
  0x35   : > { %p2532_p7 = pnand %p2530_p5, %p2490_p13  ;;  %p2539_p2 = por %p2538_p0, %p2537_p12 }
  0x37   : > { %p2533_p9 = pneg %p2532_p7 }
  0x39   : > { %p2540_p1 = pnand %p2539_p2, %p2533_p9 }
  0x3b   : > { %2543 = shalt.err (!%p2540_p1)
}
  0x3c   : > { %s2650_s10 = smov 64   ;;  %s2651_s14 = smov 4  }
  0x3d   : > { %2418 = dma.hbm_to_vmem [thread:$0]  (!%p2760_p11), %s3289_s2, 576, %s2764_s18, [#allocation6], %s2650_s10, %s2650_s10, %s2651_s14  }
  0x3e   : > { %s2819_s20 = sadd.s32 1, %s2644_s30   ;;  %s32_s22 = sadd.s32 1, %s2640_s29 }
  0x3f   : > { %s29_s21 = ssub.s32 %s2644_s30, %s2819_s20  ;;  %p39_p6 = scmp.ne.s32.totalorder %s2640_s29, %s2636_s28 }
  0x40   : > { %p30_p13 = scmp.eq.s32.totalorder %s29_s21, 0  ;;  %p40_p10 = scmp.eq.s32.totalorder %s2644_s30, 0 }
  0x41   : > { %p3304_p5 = scmp.eq.s32.totalorder %s2730_s9, 1  ;;  %p2429_p9 = scmp.lt.s32.totalorder %s2644_s30, 2 }
  0x42   : > { %s2828_s23 = scalar_select %p30_p13, %s2640_s29, %s32_s22  }
  0x43   : > { %p41_p3 = por %p40_p10, %p39_p6  ;;  %p2832_p7 = por %p3304_p5, %p39_p6 }
  0x44   : > { %s283_s16 = sand.u32 1, %s2640_s29   ;;  %s2366_s18 = sshll.u32 %s2644_s30, 7 }
  0x45   : > { %s3305_s24 = scalar_select %p2832_p7, 1, 0 }
  0x46   : > { %s2291_s25 = sshll.u32 %s283_s16, 3  ;;  %s2842_s10 = scalar_lea.hbm %s3287_s0, %s2366_s18 }
  0x47   : > { %s287_s14 = scalar_lea.vmem [#allocation2], %s2291_s25  ;;  %p2846_p11 = pnand %p2429_p9, %p41_p3 }
  0x48   : > { %s295_s17 = sshll.u32 %s287_s14, 4  ;;  %s284_s21 = scalar_lea.sflag [#allocation3], %s283_s16  ;;  %s2844_s17 = int_to_ptr.vmem [resolvable:$true] %s295_s17 }
  0x49   : > { %s2544_s22 = scalar_lea.hbm %s2842_s10, 128  ;;  %p2546_p0 = pneg %p2846_p11 }
  0x4a   : > { %p2545_p12 = scmp.ne.s32.totalorder %s2842_s10, %s2544_s22  ;;  %s2549_s26 = scalar_lea.hbm %s3287_s0, 256 }
  0x4b   : > { %p2550_p13 = scmp.lt.u32.totalorder %s2842_s10, %s3287_s0  ;;  %p2551_p6 = scmp.lt.u32.totalorder %s2549_s26, %s2544_s22 }
  0x4c   : > { %p2547_p2 = pnand %p2546_p0, %p2545_p12  ;;  %p2553_p3 = scmp.lt.u32.totalorder %s2544_s22, %s2842_s10 }
  0x4d   : > { %p2552_p10 = por %p2551_p6, %p2550_p13 }
  0x4e   : > { %p2548_p1 = pneg %p2547_p2 }
  0x4f   : > { %p2554_p5 = por %p2553_p3, %p2552_p10 }
  0x51   : > { %p2555_p9 = pnand %p2554_p5, %p2548_p1 }
  0x53   : > { %2558 = shalt.err (!%p2555_p9)
}
  0x54   : > { %s2559_s16 = scalar_lea.vmem %s2844_s17, 128  ;;  %s2652_s18 = smov [#allocation2]  }
  0x55   : > { %p2560_p12 = scmp.ne.s32.totalorder %s2844_s17, %s2559_s16  ;;  %s2564_s25 = sshll.u32 %s2652_s18, 4  ;;  %s2565_s25 = int_to_ptr.vmem [resolvable:$false] %s2564_s25 }
  0x56   : > { %s2566_s15 = scalar_lea.vmem %s2565_s25, 256  ;;  %p2567_p4 = scmp.lt.s32.totalorder %s2844_s17, %s2565_s25 }
  0x57   : > { %p2562_p2 = pnand %p2560_p12, %p2546_p0  ;;  %p2568_p13 = scmp.lt.s32.totalorder %s2566_s15, %s2559_s16 }
  0x59   : > { %p2563_p7 = pneg %p2562_p2  ;;  %p2569_p6 = por %p2568_p13, %p2567_p4 }
  0x5b   : > { %p2570_p10 = pnand %p2569_p6, %p2563_p7 }
  0x5d   : > { %2573 = shalt.err (!%p2570_p10)
}
  0x5e   : > { %2422 = dma.hbm_to_vmem [thread:$0]  (!%p2846_p11), %s2842_s10, 128, %s2844_s17, %s284_s21  }
  0x5f   : > { %304 = sbr.rel (%p2749_p8) target bundleno = 1270 (0x4f6), region = 52  ;;  %s2878_s22 = sand.u32 (!%p2749_p8), 1, %s2636_s28  }
  0x60   : > { %s3299_s26 = sshll.u32 (!%p2749_p8), %s2878_s22, 3  ;;  %s307_s14 = scalar_lea.sflag (!%p2749_p8), [#allocation3], %s2878_s22 }
  0x61   : > { %s310_s16 = scalar_lea.vmem (!%p2749_p8), [#allocation2], %s3299_s26  ;;  %p3307_p4 = scmp.ne.s32.totalorder (!%p2749_p8), %s3300_s11, 0 }
  0x66   : > { %2619 = dma.done.wait (%p3307_p4), %s307_s14, 128  }
  0x67   : > { %2621 = vsyncadd (%p3307_p4), %s307_s14, 4294967168  ;;  %p3308_p7 = scmp.eq.s32.totalorder %s2730_s9, 0 }
  0x69   : > { %2623 = dma.done.wait (%p3308_p7), [#allocation6], 864   ;;  %p3309_p8 = pmov %p3308_p7 }
  0x6a   : > { %v2653_v0 = vmov 0.0   ;;  %v2894_v1 = vld [vmem:[%s310_s16] sm:$0xff]  ;;  %s2654_s13 = smov 16   ;;  %s2655_s10 = smov 17   ;;  %v412_v3 = vlaneseq  ;;  %v353_v8 = vld [vmem:[#allocation5 + $0x2] sm:$0x3] }
  0x6b   : > { %2625 = vsyncadd (%p3309_p8), [#allocation6], 4294966432  ;;  %525 = vmatprep.mubr.f32.mxu0 %v2653_v0  ;;  %1431 = vmatprep.mubr.f32.mxu1 %v2653_v0  ;;  %v2902_v2 = vcombine.high %v2894_v1, %v2894_v1  ;;  %s2656_s11 = smov 15   ;;  %s2657_s17 = smov 1   ;;  %v351_v9 = vld [vmem:[#allocation5] sm:$0x3] }
  0x6c   : > { %430 = vrot.lane.b32.xlu0 %v2894_v1, %s2654_s13  ;;  %408 = vrot.lane.b32.xlu1 %v2894_v1, %s2655_s10  ;;  %s2658_s19 = smov 127   ;;  %s2659_s21 = smov 113   ;;  %v419_v4 = vshrl.u32 %v412_v3, 7  ;;  %v2932_v5 = vand.u32 127, %v412_v3  ;;  %v355_v16 = vld [vmem:[#allocation5 + $0x4] sm:$0x3] }
  0x6d   : > { %s2660_s18 = smov 112   ;;  %s2661_s25 = smov 111   ;;  %vm454_vm2 = vcmask 1043456   ;;  %v368_v28 = vld [vmem:[#allocation7 + $0x4] sm:$0xf]  ;;  %vm450_vm4 = vcmask 31744  }
  0x6e   : > { %v2934_v6 = vsub.s32 0, %v419_v4  ;;  %v2936_v7 = vsub.s32 1, %v419_v4  ;;  %vm434_vm0 = vcmp.lt.s32.totalorder %v2932_v5, 16  ;;  %vm414_vm1 = vcmp.lt.s32.totalorder %v2932_v5, 17  ;;  %v357_v32 = vld [vmem:[#allocation5 + $0x6] sm:$0x3] }
  0x6f   : > { %vm616_vm3 = vcmp.lt.s32.totalorder %v2932_v5, 15  ;;  %vm718_vm5 = vcmp.lt.s32.totalorder %v2932_v5, 1  ;;  %v366_v40 = vld [vmem:[#allocation7] sm:$0xf]  ;;  %v370_v45 = vld [vmem:[#allocation7 + $0x8] sm:$0xf] }
  0x70   : > { %432 = vrot.lane.b32.xlu0 %v2902_v2, %s2654_s13  ;;  %410 = vrot.lane.b32.xlu1 %v2902_v2, %s2655_s10  ;;  %v2940_v12 = vrot.slane %v353_v8, %v2934_v6  ;;  %v2944_v13 = vrot.slane %v351_v9, %v2936_v7  ;;  %v2947_v14 = vrot.slane %v353_v8, %v2936_v7  ;;  %v359_v47 = vld [vmem:[#allocation5 + $0xa] sm:$0x3]  ;;  %vm900_vm6 = vcmp.lt.s32.totalorder %v2932_v5, 127  ;;  %v372_v52 = vld [vmem:[#allocation7 + $0xc] sm:$0xf]  ;;  %s2367_s14 = sshll.u32 %s2730_s9, 7 }
  0x71   : > { %v2950_v15 = vrot.slane %v351_v9, %v2934_v6  ;;  %v2965_v26 = vrot.slane %v355_v16, %v2936_v7  ;;  %v2979_v34 = vrot.slane %v355_v16, %v2934_v6  ;;  %v2985_v38 = vrot.slane %v357_v32, %v2936_v7  ;;  %v361_v54 = vld [vmem:[#allocation5 + $0xc] sm:$0x3]  ;;  %v374_v61 = vld [vmem:[#allocation7 + $0x10] sm:$0xf]  ;;  %v376_v16 = vld [vmem:[#allocation7 + $0x14] sm:$0xf] }
  0x72   : > { %v2995_v43 = vrot.slane %v357_v32, %v2934_v6  ;;  %v3008_v50 = vrot.slane %v359_v47, %v2936_v7  ;;  %vm1002_vm7 = vcmp.lt.s32.totalorder %v2932_v5, 113  ;;  %v3019_v57 = vrot.slane %v359_v47, %v2934_v6  ;;  %v401_v47 = vld [vmem:[%s3291_s4] sm:$0xf]  ;;  %s3310_s16 = sshll.u32 %s2878_s22, 3  ;;  %p3311_p0 = scmp.ne.s32.totalorder %s3305_s24, 0 }
  0x73   : > { %v3025_v59 = vrot.slane %v361_v54, %v2936_v7  ;;  %vm1104_vm8 = vcmp.lt.s32.totalorder %v2932_v5, 112  ;;  %v3036_v8 = vrot.slane %v361_v54, %v2934_v6  ;;  %vm1206_vm9 = vcmp.lt.s32.totalorder %v2932_v5, 111  ;;  %s350_s26 = scalar_lea.vmem [#allocation8], %s3310_s16  ;;  %s2663_s9 = smov [#allocation8]  }
  0x74   : > { %614 = vrot.lane.b32.xlu1 %v2902_v2, %s2656_s11  ;;  %612 = vrot.lane.b32.xlu0 %v2894_v1, %s2656_s11 }
  0x78   : > { %716 = vrot.lane.b32.xlu1 %v2902_v2, %s2657_s17  ;;  %714 = vrot.lane.b32.xlu0 %v2894_v1, %s2657_s17 }
  0x7c   : > { %898 = vrot.lane.b32.xlu1 %v2902_v2, %s2658_s19  ;;  %896 = vrot.lane.b32.xlu0 %v2894_v1, %s2658_s19 }
  0x80   : > { %1000 = vrot.lane.b32.xlu1 %v2902_v2, %s2659_s21  ;;  %998 = vrot.lane.b32.xlu0 %v2894_v1, %s2659_s21 }
  0x84   : > { %1102 = vrot.lane.b32.xlu1 %v2902_v2, %s2660_s18  ;;  %1100 = vrot.lane.b32.xlu0 %v2894_v1, %s2660_s18 }
  0x88   : > { %1204 = vrot.lane.b32.xlu1 %v2902_v2, %s2661_s25  ;;  %1202 = vrot.lane.b32.xlu0 %v2894_v1, %s2661_s25 }
  0xde   : > { %v431_v10 = vpop.permute.xlu0 %430  ;;  %v409_v11 = vpop.permute.xlu1 %408 }
  0xe2   : > { %v433_v17 = vpop.permute.xlu0 %432  ;;  %v411_v18 = vpop.permute.xlu1 %410 }
  0xe3   : > { %v435_v19 = vsel %vm434_vm0, %v431_v10, %v433_v17  ;;  %v436_v20 = vsel %vm434_vm0, %v433_v17, %v431_v10  ;;  %v415_v21 = vsel %vm414_vm1, %v409_v11, %v411_v18  ;;  %v416_v22 = vsel %vm414_vm1, %v411_v18, %v409_v11 }
  0xe4   : > { %v448_v23 = vmul.f32 %v2940_v12, %v436_v20  ;;  %v429_v24 = vmul.f32 %v2944_v13, %v415_v21  ;;  %v449_v25 = vmul.f32 %v2947_v14, %v435_v19  ;;  %v428_v27 = vmul.f32 %v2950_v15, %v416_v22  ;;  %v365_v19 = vld [vmem:[#allocation5 + $0x10] sm:$0x3] }
  0xe6   : > { %2307 = vmatprep.subr.msk.mxu0 %vm454_vm2, %v449_v25  ;;  %v615_v29 = vpop.permute.xlu1 %614  ;;  %v613_v30 = vpop.permute.xlu0 %612 }
  0xe7   : > { %2308 = vmatpush1.msk.msra.mxu0 %vm454_vm2, %v448_v23  ;;  %v617_v31 = vsel %vm616_vm3, %v613_v30, %v615_v29  ;;  %v618_v35 = vsel %vm616_vm3, %v615_v29, %v613_v30  ;;  %v3069_v30 = vrot.slane %v365_v19, %v2934_v6 }
  0xe8   : > { %2309 = vmatmul.mubr.msk.f32.vlgmr.msra.gmra.mrb[0].mxu0 %vm450_vm4, %v368_v28  ;;  %2310 = vmatprep.subr.msk.mxu0 %vm454_vm2, %v429_v24  ;;  %v631_v33 = vmul.f32 %v2965_v26, %v617_v31  ;;  %v630_v41 = vmul.f32 %v2979_v34, %v618_v35  ;;  %v3059_v24 = vrot.slane %v365_v19, %v2936_v7  ;;  %v380_v31 = vld [vmem:[#allocation7 + $0x1c] sm:$0xf]  ;;  %v2662_v35 = vmov 0  }
  0xe9   : > { %2311 = vmatpush1.msk.msra.mxu0 %vm454_vm2, %v428_v27  ;;  %605 = vmatprep.mubr.f32.mxu0 %v2653_v0  ;;  %v378_v27 = vld [vmem:[#allocation7 + $0x18] sm:$0xf] }
  0xea   : > { %2313 = vmatprep.subr.msk.mxu0 %vm454_vm2, %v631_v33  ;;  %v717_v36 = vpop.permute.xlu1 %716  ;;  %v715_v37 = vpop.permute.xlu0 %714  ;;  %v382_v33 = vld [vmem:[#allocation7 + $0x20] sm:$0xf]  ;;  %2481 = vset.pattern.permute.xlu0 %v2662_v35 }
  0xeb   : > { %v719_v39 = vsel %vm718_vm5, %v715_v37, %v717_v36  ;;  %v720_v44 = vsel %vm718_vm5, %v717_v36, %v715_v37  ;;  %2482 = vset.pattern.permute.xlu1 %v2662_v35 }
  0xec   : > { %v733_v42 = vmul.f32 %v2985_v38, %v719_v39  ;;  %v732_v46 = vmul.f32 %v2995_v43, %v720_v44 }
  0xee   : > { %v899_v48 = vpop.permute.xlu1 %898  ;;  %v897_v49 = vpop.permute.xlu0 %896 }
  0xef   : > { %v902_v51 = vsel %vm900_vm6, %v899_v48, %v897_v49  ;;  %v901_v58 = vsel %vm900_vm6, %v897_v49, %v899_v48  ;;  %v400_v48 = vld [vmem:[%s3290_s3] sm:$0xf] }
  0xf0   : > { %2312 = vmatmul.mubr.msk.f32.vlgmr.msra.gmra.mrb[0].mxu0 %vm450_vm4, %v366_v40  ;;  %v915_v53 = vmul.f32 %v3008_v50, %v902_v51  ;;  %v914_v62 = vmul.f32 %v3019_v57, %v901_v58 }
  0xf1   : > { %2314 = vmatpush1.msk.msra.mxu0 %vm454_vm2, %v630_v41  ;;  %705 = vmatprep.mubr.f32.mxu0 %v2653_v0 }
  0xf2   : > { %2316 = vmatprep.subr.msk.mxu0 %vm454_vm2, %v733_v42  ;;  %v1001_v55 = vpop.permute.xlu1 %1000  ;;  %v999_v56 = vpop.permute.xlu0 %998 }
  0xf3   : > { %v1004_v60 = vsel %vm1002_vm7, %v1001_v55, %v999_v56  ;;  %v1003_v9 = vsel %vm1002_vm7, %v999_v56, %v1001_v55 }
  0xf4   : > { %v1017_v63 = vmul.f32 %v3025_v59, %v1004_v60  ;;  %v1016_v17 = vmul.f32 %v3036_v8, %v1003_v9 }
  0xf6   : > { %v1103_v3 = vpop.permute.xlu1 %1102  ;;  %v1101_v4 = vpop.permute.xlu0 %1100 }
  0xf7   : > { %v1106_v11 = vsel %vm1104_vm8, %v1103_v3, %v1101_v4  ;;  %v1105_v23 = vsel %vm1104_vm8, %v1101_v4, %v1103_v3 }
  0xf8   : > { %2315 = vmatmul.mubr.msk.f32.vlgmr.msra.gmra.mrb[0].mxu0 %vm450_vm4, %v370_v45 }
  0xf9   : > { %2317 = vmatpush1.msk.msra.mxu0 %vm454_vm2, %v732_v46  ;;  %807 = vmatprep.mubr.f32.mxu0 %v2653_v0 }
  0xfa   : > { %2319 = vmatprep.subr.msk.mxu0 %vm454_vm2, %v2902_v2  ;;  %v363_v2 = vld [vmem:[#allocation5 + $0xe] sm:$0x3]  ;;  %v1205_v20 = vpop.permute.xlu1 %1204  ;;  %v1203_v21 = vpop.permute.xlu0 %1202 }
  0xfb   : > { %v3042_v10 = vrot.slane %v363_v2, %v2936_v7  ;;  %v3053_v22 = vrot.slane %v363_v2, %v2934_v6  ;;  %v1208_v25 = vsel %vm1206_vm9, %v1205_v20, %v1203_v21  ;;  %v1207_v7 = vsel %vm1206_vm9, %v1203_v21, %v1205_v20 }
  0xfc   : > { %v1221_v29 = vmul.f32 %v3059_v24, %v1208_v25  ;;  %v1220_v32 = vmul.f32 %v3069_v30, %v1207_v7 }
  0xfd   : > { %v1119_v18 = vmul.f32 %v3042_v10, %v1106_v11  ;;  %v1118_v28 = vmul.f32 %v3053_v22, %v1105_v23 }
 0x100   : > { %2318 = vmatmul.mubr.msk.f32.vlgmr.msra.gmra.mrb[0].mxu0 %vm450_vm4, %v372_v52 }
 0x101   : > { %2320 = vmatpush1.msk.msra.mxu0 %vm454_vm2, %v2894_v1  ;;  %887 = vmatprep.mubr.f32.mxu0 %v2653_v0 }
 0x102   : > { %2322 = vmatprep.subr.msk.mxu0 %vm454_vm2, %v915_v53 }
 0x108   : > { %2321 = vmatmul.mubr.msk.f32.vlgmr.msra.gmra.mrb[0].mxu0 %vm450_vm4, %v374_v61 }
 0x109   : > { %2323 = vmatpush1.msk.msra.mxu0 %vm454_vm2, %v914_v62  ;;  %989 = vmatprep.mubr.f32.mxu0 %v2653_v0 }
 0x10a   : > { %2325 = vmatprep.subr.msk.mxu0 %vm454_vm2, %v1017_v63 }
 0x110   : > { %2324 = vmatmul.mubr.msk.f32.vlgmr.msra.gmra.mrb[0].mxu0 %vm450_vm4, %v376_v16 }
 0x111   : > { %2326 = vmatpush1.msk.msra.mxu0 %vm454_vm2, %v1016_v17  ;;  %1091 = vmatprep.mubr.f32.mxu0 %v2653_v0 }
 0x112   : > { %2328 = vmatprep.subr.msk.mxu0 %vm454_vm2, %v1119_v18 }
 0x118   : > { %2327 = vmatmul.mubr.msk.f32.vlgmr.msra.gmra.mrb[0].mxu0 %vm450_vm4, %v378_v27 }
 0x119   : > { %2329 = vmatpush1.msk.msra.mxu0 %vm454_vm2, %v1118_v28  ;;  %1193 = vmatprep.mubr.f32.mxu0 %v2653_v0  ;;  %v2299_v28 = vld [vmem:[%s3292_s5 + $0x4] sm:$0xf] }
 0x11a   : > { %2331 = vmatprep.subr.msk.mxu0 %vm454_vm2, %v1221_v29 }
 0x120   : > { %2330 = vmatmul.mubr.msk.f32.vlgmr.msra.gmra.mrb[0].mxu0 %vm450_vm4, %v380_v31 }
 0x121   : > { %2332 = vmatpush1.msk.msra.mxu0 %vm454_vm2, %v1220_v32  ;;  %1295 = vmatprep.mubr.f32.mxu0 %v2653_v0 }
 0x128   : > { %2333 = vmatmul.mubr.msk.f32.vlgmr.msra.gmra.mrb[0].mxu0 %vm450_vm4, %v382_v33  ;;  %v383_v33 = vld [vmem:[%s3292_s5] sm:$0xf] }
 0x1fb   : > { %v1297_v6 = vpop.f32.mrb[0].mxu0 }
 0x1fc   : > { %v1310_v36 = vmul.f32 %v1297_v6, %v1297_v6  ;;  %v1299_v37 = vpop.f32.mrb[1].mxu0  ;;  %v1304_v39 = vsel %vm454_vm2, %v1297_v6, 0.0 }
 0x1fd   : > { %v1305_v40 = vsel %vm454_vm2, %v1299_v37, 0.0  ;;  %v1311_v41 = vmul.f32 %v1299_v37, %v1299_v37 }
 0x1fe   : > { %v1306_v42 = vadd.f32 %v1305_v40, %v1304_v39  ;;  %v1312_v44 = vsel %vm454_vm2, %v1310_v36, 0.0  ;;  %v2300_v39 = vld [vmem:[%s3292_s5 + $0x8] sm:$0xf] }
 0x1ff   : > { %v1313_v45 = vsel %vm454_vm2, %v1311_v41, 0.0 }
 0x200   : > { %1307 = vadd.xlane.f32.xlu0 %v1306_v42  ;;  %v1314_v46 = vadd.f32 %v1313_v45, %v1312_v44 }
 0x202   : > { %1315 = vadd.xlane.f32.xlu1 %v1314_v46 }
 0x213   : > { %1335 = vperm.xlu1 %2482, %v401_v47  }
 0x216   : > { %1328 = vperm.xlu0 %2481, %v400_v48  }
 0x28d   : > { %v1308_v49 = vpop.xlane.xlu0 %1307 }
 0x28e   : > { %v1309_v51 = vmul.f32 0.00390625, %v1308_v49 }
 0x28f   : > { %v1316_v52 = vpop.xlane.xlu1 %1315 }
 0x290   : > { %v1317_v53 = vmul.f32 0.00390625, %v1316_v52  ;;  %v1318_v54 = vmul.f32 %v1309_v51, %v1309_v51  ;;  %v1320_v58 = vsub.f32 %v1297_v6, %v1309_v51  ;;  %v1321_v60 = vsub.f32 %v1299_v37, %v1309_v51 }
 0x292   : > { %v1319_v55 = vsub.f32 %v1317_v53, %v1318_v54 }
 0x293   : > { %v1336_v3 = vpop.permute.xlu1 %1335 }
 0x294   : > { %v1322_v56 = vadd.f32 1e-05, %v1319_v55 }
 0x295   : > { %v1329_v62 = vpop.permute.xlu0 %1328 }
 0x296   : > { %2484 = vrsqrt.f32 %v1322_v56 }
 0x2a0   : > { %v2485_v61 = vpop.eup %2484 }
 0x2a1   : > { %v1324_v63 = vmul.f32 %v2485_v61, %v1320_v58  ;;  %v1325_v2 = vmul.f32 %v2485_v61, %v1321_v60 }
 0x2a3   : > { %v1331_v4 = vmul.f32 %v1329_v62, %v1324_v63  ;;  %v1332_v9 = vmul.f32 %v1329_v62, %v1325_v2 }
 0x2a5   : > { %v1338_v11 = vadd.f32 %v1336_v3, %v1331_v4  ;;  %v1339_v16 = vadd.f32 %v1336_v3, %v1332_v9 }
 0x2a7   : > { %v3089_v17 = vmax.f32 %v1338_v11, 0.0  ;;  %v1341_v18 = vmax.f32 %v1339_v16, 0.0  ;;  %v2305_v11 = vld [vmem:[%s3292_s5 + $0x1c] sm:$0xf] }
 0x2a9   : > { %1608 = vrot.lane.b32.xlu0 %v3089_v17, %s2657_s17  ;;  %1350 = vrot.lane.b32.xlu1 %v3089_v17, %s2654_s13 }
 0x2ad   : > { %1780 = vrot.lane.b32.xlu0 %v3089_v17, %s2658_s19  ;;  %1352 = vrot.lane.b32.xlu1 %v1341_v18, %s2654_s13  ;;  %s2197_s13 = sshll.u32 %s350_s26, 4  ;;  %s3245_s13 = int_to_ptr.vmem [resolvable:$true] %s2197_s13 }
 0x2b1   : > { %1870 = vrot.lane.b32.xlu0 %v3089_v17, %s2659_s21  ;;  %1342 = vrot.lane.b32.xlu1 %v3089_v17, %s2655_s10 }
 0x2b5   : > { %1960 = vrot.lane.b32.xlu0 %v3089_v17, %s2660_s18  ;;  %1344 = vrot.lane.b32.xlu1 %v1341_v18, %s2655_s10 }
 0x2b9   : > { %2050 = vrot.lane.b32.xlu0 %v3089_v17, %s2661_s25  ;;  %1518 = vrot.lane.b32.xlu1 %v3089_v17, %s2656_s11 }
 0x2bd   : > { %1520 = vrot.lane.b32.xlu1 %v1341_v18, %s2656_s11 }
 0x2c1   : > { %1610 = vrot.lane.b32.xlu1 %v1341_v18, %s2657_s17  ;;  %s3243_s17 = scalar_lea.hbm %s3295_s8, %s2367_s14 }
 0x2c5   : > { %1782 = vrot.lane.b32.xlu1 %v1341_v18, %s2658_s19  ;;  %s2183_s19 = scalar_lea.sflag [#allocation4], %s2878_s22 }
 0x2c9   : > { %1872 = vrot.lane.b32.xlu1 %v1341_v18, %s2659_s21  ;;  %s2574_s21 = scalar_lea.vmem %s3245_s13, 128 }
 0x2ca   : > { %p2575_p11 = scmp.ne.s32.totalorder %s3245_s13, %s2574_s21 }
 0x2cc   : > { %p2576_p1 = pnand %p2575_p11, %p3311_p0 }
 0x2cd   : > { %1962 = vrot.lane.b32.xlu1 %v1341_v18, %s2660_s18  ;;  %s2578_s18 = sshll.u32 %s2663_s9, 4  ;;  %s2579_s18 = int_to_ptr.vmem [resolvable:$false] %s2578_s18 }
 0x2ce   : > { %p2577_p3 = pneg %p2576_p1  ;;  %p2581_p5 = scmp.lt.s32.totalorder %s3245_s13, %s2579_s18 }
 0x2d1   : > { %2052 = vrot.lane.b32.xlu1 %v1341_v18, %s2661_s25  ;;  %s2580_s25 = scalar_lea.vmem %s2579_s18, 256 }
 0x2d2   : > { %p2582_p9 = scmp.lt.s32.totalorder %s2580_s25, %s2574_s21 }
 0x2d4   : > { %p2583_p12 = por %p2582_p9, %p2581_p5 }
 0x2d6   : > { %p2584_p2 = pnand %p2583_p12, %p2577_p3 }
 0x31b   : > { %v1351_v19 = vpop.permute.xlu1 %1350  ;;  %v1609_v40 = vpop.permute.xlu0 %1608 }
 0x31f   : > { %v1353_v20 = vpop.permute.xlu1 %1352  ;;  %v1781_v46 = vpop.permute.xlu0 %1780 }
 0x320   : > { %v1354_v21 = vsel %vm434_vm0, %v1351_v19, %v1353_v20  ;;  %v1355_v23 = vsel %vm434_vm0, %v1353_v20, %v1351_v19 }
 0x321   : > { %v1356_v25 = vmul.f32 %v1355_v23, %v2940_v12  ;;  %v1357_v27 = vmul.f32 %v1354_v21, %v2947_v14 }
 0x323   : > { %2334 = vmatprep.subr.msk.mxu1 %vm454_vm2, %v1357_v27  ;;  %v1343_v29 = vpop.permute.xlu1 %1342  ;;  %v1871_v49 = vpop.permute.xlu0 %1870  ;;  %v402_v27 = vld [vmem:[%s3293_s6] sm:$0xf] }
 0x324   : > { %2335 = vmatpush1.msk.msra.mxu1 %vm454_vm2, %v1356_v25  ;;  %v403_v25 = vld [vmem:[%s3294_s7] sm:$0xf] }
 0x325   : > { %2336 = vmatmul.mubr.msk.f32.vlgmr.msra.gmra.mrb[0].mxu1 %vm450_vm4, %v2299_v28 }
 0x326   : > { %1511 = vmatprep.mubr.f32.mxu1 %v2653_v0 }
 0x327   : > { %v1345_v7 = vpop.permute.xlu1 %1344  ;;  %v1961_v56 = vpop.permute.xlu0 %1960 }
 0x328   : > { %v1346_v31 = vsel %vm414_vm1, %v1343_v29, %v1345_v7  ;;  %v1347_v12 = vsel %vm414_vm1, %v1345_v7, %v1343_v29 }
 0x329   : > { %v1348_v14 = vmul.f32 %v1347_v12, %v2950_v15  ;;  %v1349_v32 = vmul.f32 %v1346_v31, %v2944_v13 }
 0x32b   : > { %2337 = vmatprep.subr.msk.mxu1 %vm454_vm2, %v1349_v32  ;;  %v1519_v35 = vpop.permute.xlu1 %1518  ;;  %v2051_v63 = vpop.permute.xlu0 %2050 }
 0x32c   : > { %2338 = vmatpush1.msk.msra.mxu1 %vm454_vm2, %v1348_v14 }
 0x32d   : > { %2339 = vmatmul.mubr.msk.f32.vlgmr.msra.gmra.mrb[0].mxu1 %vm450_vm4, %v383_v33 }
 0x32e   : > { %1599 = vmatprep.mubr.f32.mxu1 %v2653_v0 }
 0x32f   : > { %v1521_v6 = vpop.permute.xlu1 %1520 }
 0x330   : > { %v1522_v36 = vsel %vm616_vm3, %v1519_v35, %v1521_v6  ;;  %v1523_v13 = vsel %vm616_vm3, %v1521_v6, %v1519_v35 }
 0x331   : > { %v1524_v15 = vmul.f32 %v1523_v13, %v2979_v34  ;;  %v1525_v37 = vmul.f32 %v1522_v36, %v2965_v26 }
 0x333   : > { %2340 = vmatprep.subr.msk.mxu1 %vm454_vm2, %v1525_v37  ;;  %v1611_v41 = vpop.permute.xlu1 %1610 }
 0x334   : > { %v1612_v42 = vsel %vm718_vm5, %v1609_v40, %v1611_v41  ;;  %v1613_v44 = vsel %vm718_vm5, %v1611_v41, %v1609_v40  ;;  %2341 = vmatpush1.msk.msra.mxu1 %vm454_vm2, %v1524_v15 }
 0x335   : > { %v1614_v34 = vmul.f32 %v1613_v44, %v2995_v43  ;;  %v1615_v26 = vmul.f32 %v1612_v42, %v2985_v38  ;;  %2342 = vmatmul.mubr.msk.f32.vlgmr.msra.gmra.mrb[0].mxu1 %vm450_vm4, %v2300_v39  ;;  %v2301_v43 = vld [vmem:[%s3292_s5 + $0xc] sm:$0xf] }
 0x336   : > { %1689 = vmatprep.mubr.f32.mxu1 %v2653_v0 }
 0x337   : > { %2343 = vmatprep.subr.msk.mxu1 %vm454_vm2, %v1615_v26  ;;  %v1783_v45 = vpop.permute.xlu1 %1782 }
 0x338   : > { %2344 = vmatpush1.msk.msra.mxu1 %vm454_vm2, %v1614_v34  ;;  %v1785_v47 = vsel %vm900_vm6, %v1783_v45, %v1781_v46  ;;  %v1784_v51 = vsel %vm900_vm6, %v1781_v46, %v1783_v45 }
 0x339   : > { %2346 = vmatprep.subr.msk.mxu1 %vm454_vm2, %v1341_v18  ;;  %v1787_v38 = vmul.f32 %v1785_v47, %v3008_v50  ;;  %v2302_v50 = vld [vmem:[%s3292_s5 + $0x10] sm:$0xf]  ;;  %v1786_v53 = vmul.f32 %v1784_v51, %v3019_v57  ;;  %v2303_v57 = vld [vmem:[%s3292_s5 + $0x14] sm:$0xf] }
 0x33b   : > { %v1873_v48 = vpop.permute.xlu1 %1872 }
 0x33c   : > { %v1875_v52 = vsel %vm1002_vm7, %v1873_v48, %v1871_v49  ;;  %v1874_v58 = vsel %vm1002_vm7, %v1871_v49, %v1873_v48 }
 0x33d   : > { %2345 = vmatmul.mubr.msk.f32.vlgmr.msra.gmra.mrb[0].mxu1 %vm450_vm4, %v2301_v43  ;;  %v1877_v54 = vmul.f32 %v1875_v52, %v3025_v59  ;;  %v1876_v59 = vmul.f32 %v1874_v58, %v3036_v8  ;;  %v2304_v8 = vld [vmem:[%s3292_s5 + $0x18] sm:$0xf] }
 0x33e   : > { %2347 = vmatpush1.msk.msra.mxu1 %vm454_vm2, %v3089_v17  ;;  %1771 = vmatprep.mubr.f32.mxu1 %v2653_v0 }
 0x33f   : > { %2349 = vmatprep.subr.msk.mxu1 %vm454_vm2, %v1787_v38  ;;  %v1963_v55 = vpop.permute.xlu1 %1962 }
 0x340   : > { %v1965_v60 = vsel %vm1104_vm8, %v1963_v55, %v1961_v56  ;;  %v1964_v2 = vsel %vm1104_vm8, %v1961_v56, %v1963_v55 }
 0x341   : > { %v1967_v61 = vmul.f32 %v1965_v60, %v3042_v10  ;;  %v1966_v10 = vmul.f32 %v1964_v2, %v3053_v22  ;;  %v2306_v22 = vld [vmem:[%s3292_s5 + $0x20] sm:$0xf] }
 0x343   : > { %v2053_v62 = vpop.permute.xlu1 %2052 }
 0x344   : > { %v2055_v3 = vsel %vm1206_vm9, %v2053_v62, %v2051_v63  ;;  %v2054_v9 = vsel %vm1206_vm9, %v2051_v63, %v2053_v62 }
 0x345   : > { %2348 = vmatmul.mubr.msk.f32.vlgmr.msra.gmra.mrb[0].mxu1 %vm450_vm4, %v2302_v50  ;;  %v2057_v4 = vmul.f32 %v2055_v3, %v3059_v24  ;;  %v2056_v16 = vmul.f32 %v2054_v9, %v3069_v30 }
 0x346   : > { %2350 = vmatpush1.msk.msra.mxu1 %vm454_vm2, %v1786_v53  ;;  %1861 = vmatprep.mubr.f32.mxu1 %v2653_v0 }
 0x347   : > { %2352 = vmatprep.subr.msk.mxu1 %vm454_vm2, %v1877_v54 }
 0x34d   : > { %2351 = vmatmul.mubr.msk.f32.vlgmr.msra.gmra.mrb[0].mxu1 %vm450_vm4, %v2303_v57 }
 0x34e   : > { %2353 = vmatpush1.msk.msra.mxu1 %vm454_vm2, %v1876_v59  ;;  %1951 = vmatprep.mubr.f32.mxu1 %v2653_v0 }
 0x34f   : > { %2355 = vmatprep.subr.msk.mxu1 %vm454_vm2, %v1967_v61 }
 0x355   : > { %2354 = vmatmul.mubr.msk.f32.vlgmr.msra.gmra.mrb[0].mxu1 %vm450_vm4, %v2304_v8 }
 0x356   : > { %2356 = vmatpush1.msk.msra.mxu1 %vm454_vm2, %v1966_v10  ;;  %2041 = vmatprep.mubr.f32.mxu1 %v2653_v0 }
 0x357   : > { %2358 = vmatprep.subr.msk.mxu1 %vm454_vm2, %v2057_v4 }
 0x35d   : > { %2357 = vmatmul.mubr.msk.f32.vlgmr.msra.gmra.mrb[0].mxu1 %vm450_vm4, %v2305_v11 }
 0x35e   : > { %2359 = vmatpush1.msk.msra.mxu1 %vm454_vm2, %v2056_v16  ;;  %2131 = vmatprep.mubr.f32.mxu1 %v2653_v0 }
 0x365   : > { %2360 = vmatmul.mubr.msk.f32.vlgmr.msra.gmra.mrb[0].mxu1 %vm450_vm4, %v2306_v22 }
 0x438   : > { %v2133_v5 = vpop.f32.mrb[0].mxu1 }
 0x439   : > { %v2146_v24 = vmul.f32 %v2133_v5, %v2133_v5  ;;  %v2135_v17 = vpop.f32.mrb[1].mxu1  ;;  %v2140_v18 = vsel %vm454_vm2, %v2133_v5, 0.0 }
 0x43a   : > { %v2141_v19 = vsel %vm454_vm2, %v2135_v17, 0.0  ;;  %v2147_v30 = vmul.f32 %v2135_v17, %v2135_v17 }
 0x43b   : > { %v2142_v20 = vadd.f32 %v2141_v19, %v2140_v18  ;;  %v2148_v21 = vsel %vm454_vm2, %v2146_v24, 0.0 }
 0x43c   : > { %v2149_v23 = vsel %vm454_vm2, %v2147_v30, 0.0 }
 0x43d   : > { %2143 = vadd.xlane.f32.xlu0 %v2142_v20  ;;  %v2150_v0 = vadd.f32 %v2149_v23, %v2148_v21 }
 0x43f   : > { %2151 = vadd.xlane.f32.xlu1 %v2150_v0 }
 0x450   : > { %2171 = vperm.xlu1 %2482, %v403_v25  }
 0x453   : > { %2164 = vperm.xlu0 %2481, %v402_v27  }
 0x4ca   : > { %v2144_v28 = vpop.xlane.xlu0 %2143 }
 0x4cb   : > { %v2145_v29 = vmul.f32 0.00390625, %v2144_v28 }
 0x4cc   : > { %v2152_v7 = vpop.xlane.xlu1 %2151 }
 0x4cd   : > { %v2153_v31 = vmul.f32 0.00390625, %v2152_v7  ;;  %v2154_v12 = vmul.f32 %v2145_v29, %v2145_v29  ;;  %v2156_v33 = vsub.f32 %v2133_v5, %v2145_v29  ;;  %v2157_v35 = vsub.f32 %v2135_v17, %v2145_v29 }
 0x4cf   : > { %v2155_v14 = vsub.f32 %v2153_v31, %v2154_v12 }
 0x4d0   : > { %v2172_v40 = vpop.permute.xlu1 %2171 }
 0x4d1   : > { %v2158_v32 = vadd.f32 1e-05, %v2155_v14 }
 0x4d2   : > { %v2165_v15 = vpop.permute.xlu0 %2164 }
 0x4d3   : > { %2486 = vrsqrt.f32 %v2158_v32 }
 0x4dd   : > { %v2487_v6 = vpop.eup %2486 }
 0x4de   : > { %v2160_v36 = vmul.f32 %v2487_v6, %v2156_v33  ;;  %v2161_v13 = vmul.f32 %v2487_v6, %v2157_v35 }
 0x4e0   : > { %v2167_v37 = vmul.f32 %v2165_v15, %v2160_v36  ;;  %v2168_v39 = vmul.f32 %v2165_v15, %v2161_v13 }
 0x4e2   : > { %v2174_v41 = vadd.f32 %v2172_v40, %v2167_v37  ;;  %v2175_v42 = vadd.f32 %v2172_v40, %v2168_v39 }
 0x4e4   : > { %v2178_v44 = vcombine.low %v2174_v41, %v2175_v42 }
 0x4e6   : > { %v2180_v34 = vadd.f32 %v2178_v44, %v2894_v1 }
 0x4e8   : > { %2181 = vst [vmem:[%s350_s26] sm:$0xff] %v2180_v34 }
 0x4e9   : > { %2587 = shalt.err (!%p2584_p2)
}
 0x4ea   : > { %s2588_s22 = scalar_lea.hbm %s3243_s17, 128  ;;  %s2592_s16 = scalar_lea.hbm %s3295_s8, 256 }
 0x4eb   : > { %p2589_p13 = scmp.ne.s32.totalorder %s3243_s17, %s2588_s22  ;;  %p2593_p4 = scmp.lt.u32.totalorder %s3243_s17, %s3295_s8 }
 0x4ec   : > { %p2594_p7 = scmp.lt.u32.totalorder %s2592_s16, %s2588_s22  ;;  %p2596_p11 = scmp.lt.u32.totalorder %s2588_s22, %s3243_s17 }
 0x4ed   : > { %p2590_p6 = pnand %p2589_p13, %p3311_p0 }
 0x4ee   : > { %p2595_p8 = por %p2594_p7, %p2593_p4 }
 0x4ef   : > { %p2591_p10 = pneg %p2590_p6 }
 0x4f0   : > { %p2597_p1 = por %p2596_p11, %p2595_p8 }
 0x4f2   : > { %p2598_p3 = pnand %p2597_p1, %p2591_p10 }
 0x4f4   : > { %2601 = shalt.err (!%p2598_p3)
}
 0x4f5   : > { %2410 = dma.vmem_to_hbm [thread:$0]  (%p3311_p0), %s3245_s13, 128, %s3243_s17, %s2183_s19  }
 0x4f6 PF: > { %s2209_s11 = sand.u32 1, %s2632_s27   ;;  %p3312_p5 = scmp.ne.s32.totalorder %s3301_s12, 0 }
 0x4f7   : > { %p3313_p9 = scmp.ge.s32.totalorder %s2644_s30, 2  ;;  %s2210_s21 = scalar_lea.sflag [#allocation4], %s2209_s11 }
 0x4f9   : > { %p2424_p12 = pnand %p3313_p9, %p3312_p5 }
 0x4fb   : > { %2627 = dma.done.wait (!%p2424_p12), %s2210_s21, 128  }
 0x4fc   : > { %2629 = vsyncadd (!%p2424_p12), %s2210_s21, 4294967168  ;;  %p22_p2 = scmp.ge.s32.totalorder %s2819_s20, 4   ;;  %s3314_s27 = smov %s2636_s28 }
 0x4fd   : > { %s3315_s28 = smov %s2640_s29  ;;  %s3316_s29 = smov %s2828_s23 }
 0x4fe   : > { %s3317_s30 = smov %s2819_s20  ;;  %24 = sbr.rel (!%p22_p2) target bundleno = 6 (0x6), region = 128 }
 0x505   :  { %2215 = vsyncpa [#allocation3], 1 }
 0x506   :  { %2217 = vsyncpa [#allocation3 + $0x1], 1 }
 0x507   :  { %2218 = vsyncpa [#allocation6], 1 }
 0x508   :  { %2219 = vsyncpa [#allocation4], 1 }
 0x509   :  { %2221 = vsyncpa [#allocation4 + $0x1], 1 }

</bundles_post_ra>
